<compile_context>
chip_gen: v5e
topology: v5e:2x2
jax: 0.10.0
libtpu: 0.0.40
codegen_flags: <defaults>
</compile_context>

<pallas_src>
import functools

import jax
import jax.numpy as jnp
from jax.experimental import pallas as pl
from jax.experimental.pallas import tpu as pltpu


def _round_up(x, m):
    return ((x + m - 1) // m) * m


def _critic_kernel(s_ref, a_ref, w1_ref, b1_ref, w2x_ref, w2a_ref, b2_ref,
                   w3_ref, b3_ref, out_ref):
    # fc1 + relu (bf16 MXU matmul, f32 accumulate, f32 VPU bias/relu)
    h1 = jnp.dot(s_ref[...], w1_ref[...], preferred_element_type=jnp.float32)
    h1 = jnp.maximum(h1 + b1_ref[...], 0.0)

    # fc2 on the (implicitly) concatenated [h1, action], + relu
    h2 = (jnp.dot(h1.astype(jnp.bfloat16), w2x_ref[...],
                  preferred_element_type=jnp.float32)
          + jnp.dot(a_ref[...], w2a_ref[...],
                    preferred_element_type=jnp.float32)
          + b2_ref[...])
    h2 = jnp.maximum(h2, 0.0)

    # fc3 (out_features == 1): skinny matmul replaced by VPU multiply + XLU
    # lane reduction; b3 read as an SMEM scalar.
    val = jnp.sum(h2 * w3_ref[...], axis=-1, keepdims=True) + b3_ref[0, 0]
    out_ref[...] = val.astype(out_ref.dtype)


def prepare_params(params):
    """One-time parameter prep (hoisted out of the forward hot path).

    Splits W2 along its input axis (so the kernel never concatenates),
    reshapes biases for in-kernel broadcast, and casts MXU operands to bf16.
    Weights are stored (in_features, out_features), i.e. transposed relative
    to nn.Linear.weight.
    """
    w1, b1, w2, b2, w3, b3 = params
    H1 = w1.shape[1]
    return dict(
        w1=w1.astype(jnp.bfloat16),            # (S,  H1)
        w2x=w2[:H1, :].astype(jnp.bfloat16),   # (H1, H2)
        w2a=w2[H1:, :].astype(jnp.bfloat16),   # (A,  H2)
        b1=b1.reshape(1, -1).astype(jnp.float32),
        b2=b2.reshape(1, -1).astype(jnp.float32),
        w3row=w3.reshape(1, -1).astype(jnp.float32),   # (1, H2) for VPU reduce
        b3=b3.reshape(1, 1).astype(jnp.float32),       # SMEM scalar
    )


def critic_forward(state, action, prepared, tb=1024):
    """state: (B, S) f32, action: (B, A) f32 -> (B, 1) f32."""
    B, S = state.shape
    A = action.shape[1]
    H1 = prepared["w1"].shape[1]
    H2 = prepared["w2x"].shape[1]

    # Batch tile: 1024 by default (fits 64 MiB v7x VMEM with large margin even
    # with double-buffered input streams); clamp for small batches, keep a
    # multiple of 16 for bf16 sublane packing.
    tb = min(tb, _round_up(B, 16))
    b_pad = _round_up(B, tb)

    s = state.astype(jnp.bfloat16)
    a = action.astype(jnp.bfloat16)
    if b_pad != B:
        s = jnp.pad(s, ((0, b_pad - B), (0, 0)))
        a = jnp.pad(a, ((0, b_pad - B), (0, 0)))

    out = pl.pallas_call(
        _critic_kernel,
        out_shape=jax.ShapeDtypeStruct((b_pad, 1), jnp.float32),
        grid=(b_pad // tb,),
        in_specs=[
            pl.BlockSpec((tb, S), lambda i: (i, 0)),      # state  (streamed)
            pl.BlockSpec((tb, A), lambda i: (i, 0)),      # action (streamed)
            pl.BlockSpec((S, H1), lambda i: (0, 0)),      # w1     (resident)
            pl.BlockSpec((1, H1), lambda i: (0, 0)),      # b1     (resident)
            pl.BlockSpec((H1, H2), lambda i: (0, 0)),     # w2[:H1](resident)
            pl.BlockSpec((A, H2), lambda i: (0, 0)),      # w2[H1:](resident)
            pl.BlockSpec((1, H2), lambda i: (0, 0)),      # b2     (resident)
            pl.BlockSpec((1, H2), lambda i: (0, 0)),      # w3 row (resident)
            pl.BlockSpec(memory_space=pltpu.MemorySpace.SMEM),  # b3 scalar
        ],
        out_specs=pl.BlockSpec((tb, 1), lambda i: (i, 0)),
        compiler_params=pltpu.CompilerParams(
            dimension_semantics=("parallel",)),
    )(s, a, prepared["w1"], prepared["b1"], prepared["w2x"],
      prepared["w2a"], prepared["b2"], prepared["w3row"], prepared["b3"])

    if b_pad != B:
        out = out[:B]
    return out


def init_params(key, state_size, action_size, layers=(256, 256, 128)):
    """Deterministic init mirroring the PyTorch module's shapes / init ranges.

    Weights are stored as (in_features, out_features) — i.e. transposed
    relative to nn.Linear.weight — so the kernel uses them directly.
    Only layers[0] and layers[1] are used, exactly as in the PyTorch module.
    """
    h1, h2 = layers[0], layers[1]
    k = jax.random.split(key, 6)

    # hidden_init uses weight.size()[0] == out_features in the original code.
    lim1 = 1.0 / jnp.sqrt(jnp.float32(h1))
    lim2 = 1.0 / jnp.sqrt(jnp.float32(h2))

    w1 = jax.random.uniform(k[0], (state_size, h1), jnp.float32, -lim1, lim1)
    b1 = jax.random.uniform(k[1], (h1,), jnp.float32,
                            -1.0 / jnp.sqrt(jnp.float32(state_size)),
                            1.0 / jnp.sqrt(jnp.float32(state_size)))
    w2 = jax.random.uniform(k[2], (h1 + action_size, h2), jnp.float32, -lim2, lim2)
    b2 = jax.random.uniform(k[3], (h2,), jnp.float32,
                            -1.0 / jnp.sqrt(jnp.float32(h1 + action_size)),
                            1.0 / jnp.sqrt(jnp.float32(h1 + action_size)))
    w3 = jax.random.uniform(k[4], (h2, 1), jnp.float32, -0.003, 0.003)
    b3 = jax.random.uniform(k[5], (1,), jnp.float32,
                            -1.0 / jnp.sqrt(jnp.float32(h2)),
                            1.0 / jnp.sqrt(jnp.float32(h2)))
    return (w1, b1, w2, b2, w3, b3)


def critic_reference(state, action, params):
    """Pure-JAX f32 reference of the PyTorch forward pass."""
    w1, b1, w2, b2, w3, b3 = params
    x = jax.nn.relu(state @ w1 + b1)
    x = jnp.concatenate([x, action], axis=1)
    x = jax.nn.relu(x @ w2 + b2)
    return x @ w3 + b3


if __name__ == "__main__":
    batch = 8
    state_size = 32
    action_size = 8
    layers = (256, 256, 128)   # module default: fc1->256, fc2->256, fc3->1

    key = jax.random.PRNGKey(0)
    k_state, k_action, k_params = jax.random.split(key, 3)

    state = jax.random.normal(k_state, (batch, state_size), jnp.float32)
    action = jax.random.normal(k_action, (batch, action_size), jnp.float32)
    params = init_params(k_params, state_size, action_size, layers)

    prepared = prepare_params(params)            # one-time weight prep (hoisted)
    fwd = jax.jit(functools.partial(critic_forward, tb=1024))

    out = fwd(state, action, prepared)
    out = jax.block_until_ready(out)

    ref = critic_reference(state, action, params)
    assert out.shape == (batch, 1), out.shape
    # bf16 MXU operands with f32 accumulation -> compare against the f32
    # reference with a correspondingly looser tolerance.
    assert jnp.allclose(out, ref, atol=5e-3, rtol=5e-3), (out, ref)

    print("KERNEL_OK")
</pallas_src>

<mosaic_0001>
module attributes {stable_mosaic.version = 11 : i64} {
  func.func @_critic_kernel(%arg0: i32, %arg1: memref<16x32xbf16, #tpu.memory_space<vmem>>, %arg2: memref<16x8xbf16, #tpu.memory_space<vmem>>, %arg3: memref<32x256xbf16, #tpu.memory_space<vmem>>, %arg4: memref<1x256xf32, #tpu.memory_space<vmem>>, %arg5: memref<256x256xbf16, #tpu.memory_space<vmem>>, %arg6: memref<8x256xbf16, #tpu.memory_space<vmem>>, %arg7: memref<1x256xf32, #tpu.memory_space<vmem>>, %arg8: memref<1x256xf32, #tpu.memory_space<vmem>>, %arg9: memref<1x1xf32, #tpu.memory_space<smem>>, %arg10: memref<16x1xf32, #tpu.memory_space<vmem>>) attributes {dimension_semantics = [#tpu.dimension_semantics<parallel>], iteration_bounds = array<i64: 1>, scalar_prefetch = 0 : i64, scratch_operands = 0 : i64, tpu.core_type = #tpu.core_type<tc>, window_params = [{transform_indices = @transform_0, window_bounds = array<i64: 16, 32>}, {transform_indices = @transform_1, window_bounds = array<i64: 16, 8>}, {pipeline_mode = #tpu.pipeline_mode<synchronous>, transform_indices = @transform_2, window_bounds = array<i64: 32, 256>}, {pipeline_mode = #tpu.pipeline_mode<synchronous>, transform_indices = @transform_3, window_bounds = array<i64: 1, 256>}, {pipeline_mode = #tpu.pipeline_mode<synchronous>, transform_indices = @transform_4, window_bounds = array<i64: 256, 256>}, {pipeline_mode = #tpu.pipeline_mode<synchronous>, transform_indices = @transform_5, window_bounds = array<i64: 8, 256>}, {pipeline_mode = #tpu.pipeline_mode<synchronous>, transform_indices = @transform_6, window_bounds = array<i64: 1, 256>}, {pipeline_mode = #tpu.pipeline_mode<synchronous>, transform_indices = @transform_7, window_bounds = array<i64: 1, 256>}, {transform_indices = @transform_8, window_bounds = array<i64: 1, 1>}, {transform_indices = @transform_9, window_bounds = array<i64: 16, 1>}]} {
    %c0 = arith.constant 0 : index
    %c0_0 = arith.constant 0 : index
    %0 = vector.load %arg1[%c0, %c0_0] : memref<16x32xbf16, #tpu.memory_space<vmem>>, vector<16x32xbf16>
    %c0_1 = arith.constant 0 : index
    %c0_2 = arith.constant 0 : index
    %1 = vector.load %arg3[%c0_1, %c0_2] : memref<32x256xbf16, #tpu.memory_space<vmem>>, vector<32x256xbf16>
    %cst = arith.constant dense<0.000000e+00> : vector<16x256xf32>
    %2 = tpu.matmul %0, %1, %cst {dimension_numbers = #tpu.dot_dimension_numbers<[1], [0], [0], [1], [0, 0, 1, 1], [], []>} : vector<16x32xbf16>, vector<32x256xbf16>, vector<16x256xf32> -> vector<16x256xf32>
    %c0_3 = arith.constant 0 : index
    %c0_4 = arith.constant 0 : index
    %3 = vector.load %arg4[%c0_3, %c0_4] : memref<1x256xf32, #tpu.memory_space<vmem>>, vector<1x256xf32>
    %4 = vector.broadcast %3 : vector<1x256xf32> to vector<16x256xf32>
    %5 = arith.addf %2, %4 : vector<16x256xf32>
    %cst_5 = arith.constant 0.000000e+00 : f32
    %6 = vector.broadcast %cst_5 : f32 to vector<16x256xf32>
    %7 = arith.maximumf %5, %6 : vector<16x256xf32>
    %8 = arith.truncf %7 : vector<16x256xf32> to vector<16x256xbf16>
    %c0_6 = arith.constant 0 : index
    %c0_7 = arith.constant 0 : index
    %9 = vector.load %arg5[%c0_6, %c0_7] : memref<256x256xbf16, #tpu.memory_space<vmem>>, vector<256x256xbf16>
    %cst_8 = arith.constant dense<0.000000e+00> : vector<16x256xf32>
    %10 = tpu.matmul %8, %9, %cst_8 {dimension_numbers = #tpu.dot_dimension_numbers<[1], [0], [0], [1], [0, 0, 1, 1], [], []>} : vector<16x256xbf16>, vector<256x256xbf16>, vector<16x256xf32> -> vector<16x256xf32>
    %c0_9 = arith.constant 0 : index
    %c0_10 = arith.constant 0 : index
    %11 = vector.load %arg2[%c0_9, %c0_10] : memref<16x8xbf16, #tpu.memory_space<vmem>>, vector<16x8xbf16>
    %c0_11 = arith.constant 0 : index
    %c0_12 = arith.constant 0 : index
    %12 = vector.load %arg6[%c0_11, %c0_12] : memref<8x256xbf16, #tpu.memory_space<vmem>>, vector<8x256xbf16>
    %cst_13 = arith.constant dense<0.000000e+00> : vector<16x256xf32>
    %13 = tpu.matmul %11, %12, %cst_13 {dimension_numbers = #tpu.dot_dimension_numbers<[1], [0], [0], [1], [0, 0, 1, 1], [], []>} : vector<16x8xbf16>, vector<8x256xbf16>, vector<16x256xf32> -> vector<16x256xf32>
    %14 = arith.addf %10, %13 : vector<16x256xf32>
    %c0_14 = arith.constant 0 : index
    %c0_15 = arith.constant 0 : index
    %15 = vector.load %arg7[%c0_14, %c0_15] : memref<1x256xf32, #tpu.memory_space<vmem>>, vector<1x256xf32>
    %16 = vector.broadcast %15 : vector<1x256xf32> to vector<16x256xf32>
    %17 = arith.addf %14, %16 : vector<16x256xf32>
    %cst_16 = arith.constant 0.000000e+00 : f32
    %18 = vector.broadcast %cst_16 : f32 to vector<16x256xf32>
    %19 = arith.maximumf %17, %18 : vector<16x256xf32>
    %c0_17 = arith.constant 0 : index
    %c0_18 = arith.constant 0 : index
    %20 = vector.load %arg8[%c0_17, %c0_18] : memref<1x256xf32, #tpu.memory_space<vmem>>, vector<1x256xf32>
    %21 = vector.broadcast %20 : vector<1x256xf32> to vector<16x256xf32>
    %22 = arith.mulf %19, %21 : vector<16x256xf32>
    %cst_19 = arith.constant dense<0.000000e+00> : vector<16xf32>
    %23 = vector.multi_reduction <add>, %22, %cst_19 [1] : vector<16x256xf32> to vector<16xf32>
    %24 = vector.shape_cast %23 : vector<16xf32> to vector<16x1xf32>
    %c0_20 = arith.constant 0 : index
    %c0_21 = arith.constant 0 : index
    %25 = memref.load %arg9[%c0_20, %c0_21] : memref<1x1xf32, #tpu.memory_space<smem>>
    %26 = vector.broadcast %25 : f32 to vector<16x1xf32>
    %27 = arith.addf %24, %26 : vector<16x1xf32>
    %c0_22 = arith.constant 0 : index
    %c0_23 = arith.constant 0 : index
    %28 = vector.load %arg10[%c0_22, %c0_23] : memref<16x1xf32, #tpu.memory_space<vmem>>, vector<16x1xf32>
    tpu.vector_store %arg10[%c0_22, %c0_23], %27 {strides = array<i32>} : memref<16x1xf32, #tpu.memory_space<vmem>>, vector<16x1xf32>,
    return
  }
  func.func @transform_0(%arg0: i32) -> (i32, i32) {
    %c0_i32 = arith.constant 0 : i32
    %c0_i32_0 = arith.constant 0 : i32
    return %arg0, %c0_i32 : i32, i32
  }
  func.func @transform_1(%arg0: i32) -> (i32, i32) {
    %c0_i32 = arith.constant 0 : i32
    %c0_i32_0 = arith.constant 0 : i32
    return %arg0, %c0_i32 : i32, i32
  }
  func.func @transform_2(%arg0: i32) -> (i32, i32) {
    %c0_i32 = arith.constant 0 : i32
    %c0_i32_0 = arith.constant 0 : i32
    %c0_i32_1 = arith.constant 0 : i32
    return %c0_i32, %c0_i32_0 : i32, i32
  }
  func.func @transform_3(%arg0: i32) -> (i32, i32) {
    %c0_i32 = arith.constant 0 : i32
    %c0_i32_0 = arith.constant 0 : i32
    %c0_i32_1 = arith.constant 0 : i32
    return %c0_i32, %c0_i32_0 : i32, i32
  }
  func.func @transform_4(%arg0: i32) -> (i32, i32) {
    %c0_i32 = arith.constant 0 : i32
    %c0_i32_0 = arith.constant 0 : i32
    %c0_i32_1 = arith.constant 0 : i32
    return %c0_i32, %c0_i32_0 : i32, i32
  }
  func.func @transform_5(%arg0: i32) -> (i32, i32) {
    %c0_i32 = arith.constant 0 : i32
    %c0_i32_0 = arith.constant 0 : i32
    %c0_i32_1 = arith.constant 0 : i32
    return %c0_i32, %c0_i32_0 : i32, i32
  }
  func.func @transform_6(%arg0: i32) -> (i32, i32) {
    %c0_i32 = arith.constant 0 : i32
    %c0_i32_0 = arith.constant 0 : i32
    %c0_i32_1 = arith.constant 0 : i32
    return %c0_i32, %c0_i32_0 : i32, i32
  }
  func.func @transform_7(%arg0: i32) -> (i32, i32) {
    %c0_i32 = arith.constant 0 : i32
    %c0_i32_0 = arith.constant 0 : i32
    %c0_i32_1 = arith.constant 0 : i32
    return %c0_i32, %c0_i32_0 : i32, i32
  }
  func.func @transform_8(%arg0: i32) -> (i32, i32) {
    %c0_i32 = arith.constant 0 : i32
    %c0_i32_0 = arith.constant 0 : i32
    %c0_i32_1 = arith.constant 0 : i32
    return %c0_i32, %c0_i32_0 : i32, i32
  }
  func.func @transform_9(%arg0: i32) -> (i32, i32) {
    %c0_i32 = arith.constant 0 : i32
    %c0_i32_0 = arith.constant 0 : i32
    return %arg0, %c0_i32 : i32, i32
  }
}

</mosaic_0001>

<bundles_post_ra>
// kernel: critic_forward.1
= control target key start
LH: loop header
LB: loop body
LE: loop exit
PB: predicated region body
PF: predicated region fallthrough
CT: control target
= control target key end

     0   :  { %15 = vsyncpa [#allocation4], 0  ;;  %s827_s0 = inlined_call_operand.vmem [shape: bf16[16,32], index: 0, kind: input, shape index: {}]   ;;  %s828_s1 = inlined_call_operand.vmem [shape: bf16[16,8], index: 1, kind: input, shape index: {}]   ;;  %s829_s2 = inlined_call_operand.hbm [shape: bf16[32,256], index: 2, kind: input, shape index: {}]   ;;  %s830_s3 = inlined_call_operand.vmem [shape: f32[1,256], index: 3, kind: input, shape index: {}]   ;;  %s831_s4 = inlined_call_operand.hbm [shape: bf16[256,256], index: 4, kind: input, shape index: {}]   ;;  %s832_s5 = inlined_call_operand.vmem [shape: bf16[8,256], index: 5, kind: input, shape index: {}]   ;;  %s833_s6 = inlined_call_operand.vmem [shape: f32[1,256], index: 6, kind: input, shape index: {}]   ;;  %s834_s7 = inlined_call_operand.vmem [shape: f32[1,256], index: 7, kind: input, shape index: {}]   ;;  %s835_s8 = inlined_call_operand.<no memory space> [shape: f32[1,1], index: 8, kind: input, shape index: {}]   ;;  %s836_s9 = inlined_call_operand.vmem [shape: f32[16,1], index: 9, kind: output, shape index: {}]  }
   0x1   :  { %s25_s11 = sshll.u32 %s829_s2, 4  ;;  %s26_s11 = int_to_ptr.hbm [resolvable:$true] %s25_s11 }
   0x2   :  { %16 = vsyncpa [#allocation6], 0  ;;  %s734_s12 = smov [#allocation3]   ;;  %s40_s16 = sshll.u32 %s831_s4, 4  ;;  %s41_s16 = int_to_ptr.hbm [resolvable:$true] %s40_s16 }
   0x3   :  { %s27_s13 = sshll.u32 %s734_s12, 4  ;;  %s735_s17 = smov 128   ;;  %s28_s13 = int_to_ptr.vmem [resolvable:$true] %s27_s13 }
   0x4   :  { %s736_s18 = smov 8   ;;  %s737_s19 = smov [#allocation5]  }
   0x5   :  { %33 = dma.hbm_to_vmem [thread:$0]  %s26_s11, 512, %s28_s13, [#allocation4], %s735_s17, %s735_s17, %s736_s18  }
   0x6   :  { %s42_s20 = sshll.u32 %s737_s19, 4  ;;  %s43_s20 = int_to_ptr.vmem [resolvable:$true] %s42_s20 }
   0x7   :  { %48 = dma.hbm_to_vmem [thread:$0]  %s41_s16, 4096, %s43_s20, [#allocation6], %s735_s17, %s735_s17, %s736_s18  }
   0x8   :  { %730 = dma.done.wait [#allocation4], 512  }
   0x9   :  { %731 = vsyncadd [#allocation4], 4294966784 }
   0xa   :  { %732 = dma.done.wait [#allocation6], 4096  }
   0xb   :  { %733 = vsyncadd [#allocation6], 4294963200  ;;  %v498_v0 = vld [vmem:[#allocation3 + $0x10] sm:$0xf]  ;;  %v644_v1 = vld [vmem:[#allocation3 + $0x14] sm:$0xf0] }
   0xc   :  { %v643_v2 = vld [vmem:[#allocation3 + $0x14] sm:$0xf]  ;;  %v499_v3 = vor.u32 %v644_v1, %v498_v0  ;;  %v500_v4 = vld [vmem:[#allocation3 + $0x18] sm:$0xf0]  ;;  %v490_v5 = vld [vmem:[#allocation3] sm:$0xf] }
   0xd   :  { %v642_v6 = vld [vmem:[#allocation3 + $0x4] sm:$0xf0]  ;;  %v503_v7 = vor.u32 %v643_v2, %v500_v4  ;;  %v641_v8 = vld [vmem:[#allocation3 + $0x4] sm:$0xf]  ;;  %v492_v9 = vld [vmem:[#allocation3 + $0x8] sm:$0xf0] }
   0xe   :  { %vm103_vm0 = vcmask 261120   ;;  %113 = vmatpush.bf16.msra.mxu0 %v499_v3  ;;  %v491_v10 = vor.u32 %v642_v6, %v490_v5  ;;  %v175_v11 = vld [vmem:[%s832_s5] sm:$0xff]  ;;  %vm190_vm1 = vcmask 1043456   ;;  %v570_v12 = vld [vmem:[#allocation5 + $0x70] sm:$0xf]  ;;  %v495_v14 = vor.u32 %v641_v8, %v492_v9 }
   0xf   :  { %v660_v13 = vld [vmem:[#allocation5 + $0x74] sm:$0xf0]  ;;  %127 = vmatpush.bf16.msra.mxu1 %v503_v7  ;;  %v182_v15 = vunpack.c.l.b16 %v175_v11  ;;  %v183_v16 = vunpack.c.h.b16 %v175_v11  ;;  %v634_v17 = vld [vmem:[#allocation5 + $0xf0] sm:$0xf]  ;;  %v659_v19 = vld [vmem:[#allocation5 + $0x74] sm:$0xf] }
  0x10   :  { %v676_v18 = vld [vmem:[#allocation5 + $0xf4] sm:$0xf0]  ;;  %v572_v20 = vld [vmem:[#allocation5 + $0x78] sm:$0xf0]  ;;  %v675_v21 = vld [vmem:[#allocation5 + $0xf4] sm:$0xf]  ;;  %v571_v26 = vor.u32 %v660_v13, %v570_v12 }
  0x11   :  { %v636_v22 = vld [vmem:[#allocation5 + $0xf8] sm:$0xf0]  ;;  %v640_v23 = vld [vmem:[%s827_s0] sm:$0xff]  ;;  %v184_v24 = vpack.c.b16 %v182_v15, %v182_v15  ;;  %v185_v25 = vpack.c.b16 %v183_v16, %v183_v16  ;;  %v575_v27 = vor.u32 %v659_v19, %v572_v20  ;;  %v635_v29 = vor.u32 %v676_v18, %v634_v17  ;;  %v658_v30 = vld [vmem:[#allocation5 + $0x64] sm:$0xf0] }
  0x12   :  { %v562_v28 = vld [vmem:[#allocation5 + $0x60] sm:$0xf]  ;;  %114 = vmatpush.bf16.msra.mxu0 %v491_v10  ;;  %v657_v31 = vld [vmem:[#allocation5 + $0x64] sm:$0xf]  ;;  %v564_v32 = vld [vmem:[#allocation5 + $0x68] sm:$0xf0]  ;;  %v639_v35 = vor.u32 %v675_v21, %v636_v22 }
  0x13   :  { %128 = vmatpush.bf16.msra.mxu1 %v495_v14  ;;  %v192_v33 = vsel %vm190_vm1, %v184_v24, 0  ;;  %v195_v34 = vsel %vm190_vm1, %v185_v25, 0  ;;  %v626_v36 = vld [vmem:[#allocation5 + $0xe0] sm:$0xf]  ;;  %v674_v37 = vld [vmem:[#allocation5 + $0xe4] sm:$0xf0]  ;;  %v567_v38 = vor.u32 %v657_v31, %v564_v32  ;;  %v563_v42 = vor.u32 %v658_v30, %v562_v28 }
  0x14   :  { %204 = vmatpush.bf16.msra.mxu2 %v192_v33  ;;  %218 = vmatpush.bf16.msra.mxu3 %v195_v34  ;;  %v673_v39 = vld [vmem:[#allocation5 + $0xe4] sm:$0xf]  ;;  %v628_v40 = vld [vmem:[#allocation5 + $0xe8] sm:$0xf0]  ;;  %vm186_vm2 = vcmask 64512   ;;  %v627_v44 = vor.u32 %v674_v37, %v626_v36  ;;  %vm475_vm3 = vcmask 7168  }
  0x15   :  { %v677_v41 = vld [vmem:[%s828_s1] sm:$0xff]  ;;  %504 = vmatmul.msk.bf16.vlgmr.msra.gmra.mxu0 %vm103_vm0, %v640_v23  ;;  %v655_v43 = vld [vmem:[#allocation5 + $0x54] sm:$0xf]  ;;  %v554_v45 = vld [vmem:[#allocation5 + $0x50] sm:$0xf]  ;;  %v631_v48 = vor.u32 %v673_v39, %v628_v40 }
  0x16   :  { %413 = vmatpush.bf16.msrb.mxu0 %v575_v27  ;;  %505 = vmatmul.msk.bf16.vlgmr.msra.gmra.mxu1 %vm103_vm0, %v640_v23  ;;  %v656_v46 = vld [vmem:[#allocation5 + $0x54] sm:$0xf0]  ;;  %v556_v47 = vld [vmem:[#allocation5 + $0x58] sm:$0xf0]  ;;  %v618_v49 = vld [vmem:[#allocation5 + $0xd0] sm:$0xf] }
  0x17   :  { %427 = vmatpush.bf16.msrb.mxu1 %v639_v35  ;;  %v672_v50 = vld [vmem:[#allocation5 + $0xd4] sm:$0xf0]  ;;  %v559_v51 = vor.u32 %v655_v43, %v556_v47  ;;  %v671_v52 = vld [vmem:[#allocation5 + $0xd4] sm:$0xf]  ;;  %510 = vmatmul.msk.bf16.vlgmr.msra.gmra.mxu2 %vm186_vm2, %v677_v41  ;;  %v620_v53 = vld [vmem:[#allocation5 + $0xd8] sm:$0xf0]  ;;  %v555_v56 = vor.u32 %v656_v46, %v554_v45 }
  0x18   :  { %385 = vmatpush.bf16.msrb.mxu2 %v571_v26  ;;  %399 = vmatpush.bf16.msrb.mxu3 %v635_v29  ;;  %v653_v54 = vld [vmem:[#allocation5 + $0x44] sm:$0xf]  ;;  %v548_v55 = vld [vmem:[#allocation5 + $0x48] sm:$0xf0]  ;;  %v619_v57 = vor.u32 %v672_v50, %v618_v49  ;;  %v546_v58 = vld [vmem:[#allocation5 + $0x40] sm:$0xf]  ;;  %v623_v60 = vor.u32 %v671_v52, %v620_v53 }
  0x19   :  { %511 = vmatmul.msk.bf16.vlgmr.msra.gmra.mxu3 %vm186_vm2, %v677_v41  ;;  %v654_v59 = vld [vmem:[#allocation5 + $0x44] sm:$0xf0]  ;;  %v610_v61 = vld [vmem:[#allocation5 + $0xc0] sm:$0xf]  ;;  %v551_v63 = vor.u32 %v653_v54, %v548_v55  ;;  %v669_v0 = vld [vmem:[#allocation5 + $0xc4] sm:$0xf] }
  0x1a   :  { %414 = vmatpush.bf16.msrb.mxu0 %v567_v38  ;;  %v670_v62 = vld [vmem:[#allocation5 + $0xc4] sm:$0xf0]  ;;  %v612_v1 = vld [vmem:[#allocation5 + $0xc8] sm:$0xf0]  ;;  %v547_v2 = vor.u32 %v654_v59, %v546_v58  ;;  %v538_v5 = vld [vmem:[#allocation5 + $0x30] sm:$0xf] }
  0x1b   :  { %428 = vmatpush.bf16.msrb.mxu1 %v631_v48  ;;  %v611_v3 = vor.u32 %v670_v62, %v610_v61  ;;  %v615_v4 = vor.u32 %v669_v0, %v612_v1  ;;  %v652_v6 = vld [vmem:[#allocation5 + $0x34] sm:$0xf0]  ;;  %v602_v7 = vld [vmem:[#allocation5 + $0xb0] sm:$0xf]  ;;  %v651_v10 = vld [vmem:[#allocation5 + $0x34] sm:$0xf] }
  0x1c   :  { %386 = vmatpush.bf16.msrb.mxu2 %v563_v42  ;;  %400 = vmatpush.bf16.msrb.mxu3 %v627_v44  ;;  %v539_v8 = vor.u32 %v652_v6, %v538_v5  ;;  %v668_v9 = vld [vmem:[#allocation5 + $0xb4] sm:$0xf0]  ;;  %v540_v11 = vld [vmem:[#allocation5 + $0x38] sm:$0xf0]  ;;  %v667_v14 = vld [vmem:[#allocation5 + $0xb4] sm:$0xf] }
  0x1d   :  { %v603_v12 = vor.u32 %v668_v9, %v602_v7  ;;  %v543_v13 = vor.u32 %v651_v10, %v540_v11  ;;  %v604_v15 = vld [vmem:[#allocation5 + $0xb8] sm:$0xf0]  ;;  %v530_v17 = vld [vmem:[#allocation5 + $0x20] sm:$0xf]  ;;  %v650_v18 = vld [vmem:[#allocation5 + $0x24] sm:$0xf0] }
  0x1e   :  { %415 = vmatpush.bf16.msrb.mxu0 %v559_v51  ;;  %v607_v16 = vor.u32 %v667_v14, %v604_v15  ;;  %v531_v19 = vor.u32 %v650_v18, %v530_v17  ;;  %v594_v20 = vld [vmem:[#allocation5 + $0xa0] sm:$0xf]  ;;  %v666_v21 = vld [vmem:[#allocation5 + $0xa4] sm:$0xf0]  ;;  %v649_v22 = vld [vmem:[#allocation5 + $0x24] sm:$0xf] }
  0x1f   :  { %429 = vmatpush.bf16.msrb.mxu1 %v623_v60  ;;  %v595_v23 = vor.u32 %v666_v21, %v594_v20  ;;  %v532_v24 = vld [vmem:[#allocation5 + $0x28] sm:$0xf0]  ;;  %v665_v25 = vld [vmem:[#allocation5 + $0xa4] sm:$0xf]  ;;  %v522_v29 = vld [vmem:[#allocation5 + $0x10] sm:$0xf] }
  0x20   :  { %387 = vmatpush.bf16.msrb.mxu2 %v555_v56  ;;  %401 = vmatpush.bf16.msrb.mxu3 %v619_v57  ;;  %v596_v26 = vld [vmem:[#allocation5 + $0xa8] sm:$0xf0]  ;;  %v535_v27 = vor.u32 %v649_v22, %v532_v24  ;;  %v648_v30 = vld [vmem:[#allocation5 + $0x14] sm:$0xf0]  ;;  %v586_v31 = vld [vmem:[#allocation5 + $0x90] sm:$0xf] }
  0x21   :  { %v599_v28 = vor.u32 %v665_v25, %v596_v26  ;;  %v523_v32 = vor.u32 %v648_v30, %v522_v29  ;;  %v664_v33 = vld [vmem:[#allocation5 + $0x94] sm:$0xf0]  ;;  %v647_v34 = vld [vmem:[#allocation5 + $0x14] sm:$0xf]  ;;  %v524_v35 = vld [vmem:[#allocation5 + $0x18] sm:$0xf0] }
  0x22   :  { %416 = vmatpush.bf16.msrb.mxu0 %v551_v63  ;;  %v587_v36 = vor.u32 %v664_v33, %v586_v31  ;;  %v527_v37 = vor.u32 %v647_v34, %v524_v35  ;;  %v663_v38 = vld [vmem:[#allocation5 + $0x94] sm:$0xf]  ;;  %v588_v39 = vld [vmem:[#allocation5 + $0x98] sm:$0xf0]  ;;  %v514_v41 = vld [vmem:[#allocation5] sm:$0xf] }
  0x23   :  { %430 = vmatpush.bf16.msrb.mxu1 %v615_v4  ;;  %v591_v40 = vor.u32 %v663_v38, %v588_v39  ;;  %v646_v42 = vld [vmem:[#allocation5 + $0x4] sm:$0xf0]  ;;  %v578_v43 = vld [vmem:[#allocation5 + $0x80] sm:$0xf]  ;;  %v645_v46 = vld [vmem:[#allocation5 + $0x4] sm:$0xf] }
  0x24   :  { %388 = vmatpush.bf16.msrb.mxu2 %v547_v2  ;;  %402 = vmatpush.bf16.msrb.mxu3 %v611_v3  ;;  %v515_v44 = vor.u32 %v646_v42, %v514_v41  ;;  %v662_v45 = vld [vmem:[#allocation5 + $0x84] sm:$0xf0]  ;;  %v516_v47 = vld [vmem:[#allocation5 + $0x8] sm:$0xf0]  ;;  %v661_v50 = vld [vmem:[#allocation5 + $0x84] sm:$0xf] }
  0x25   :  { %v579_v48 = vor.u32 %v662_v45, %v578_v43  ;;  %v519_v49 = vor.u32 %v645_v46, %v516_v47  ;;  %v580_v51 = vld [vmem:[#allocation5 + $0x88] sm:$0xf0]  ;;  %v72_v53 = vld [vmem:[%s830_s3] sm:$0x3]  ;;  %v472_v46 = vstv %s835_s8 }
  0x26   :  { %417 = vmatpush.bf16.msrb.mxu0 %v543_v13  ;;  %v583_v52 = vor.u32 %v661_v50, %v580_v51  ;;  %v74_v56 = vperm.slane %v72_v53, 0  ;;  %v75_v57 = vperm.slane %v72_v53, 1  ;;  %v441_v11 = vld [vmem:[%s833_s6] sm:$0x3] }
  0x27   :  { %431 = vmatpush.bf16.msrb.mxu1 %v607_v16  ;;  %v444_v15 = vperm.slane %v441_v11, 1  ;;  %v443_v20 = vperm.slane %v441_v11, 0  ;;  %v455_v21 = vld [vmem:[%s834_s7] sm:$0x3] }
  0x28   :  { %389 = vmatpush.bf16.msrb.mxu2 %v539_v8  ;;  %403 = vmatpush.bf16.msrb.mxu3 %v603_v12  ;;  %v458_v26 = vperm.slane %v455_v21, 1  ;;  %v457_v30 = vperm.slane %v455_v21, 0 }
  0x2a   :  { %418 = vmatpush.bf16.msrb.mxu0 %v535_v27 }
  0x2b   :  { %432 = vmatpush.bf16.msrb.mxu1 %v599_v28 }
  0x2c   :  { %390 = vmatpush.bf16.msrb.mxu2 %v531_v19  ;;  %404 = vmatpush.bf16.msrb.mxu3 %v595_v23 }
  0x2e   :  { %419 = vmatpush.bf16.msrb.mxu0 %v527_v37 }
  0x2f   :  { %433 = vmatpush.bf16.msrb.mxu1 %v591_v40 }
  0x30   :  { %391 = vmatpush.bf16.msrb.mxu2 %v523_v32  ;;  %405 = vmatpush.bf16.msrb.mxu3 %v587_v36 }
  0x32   :  { %420 = vmatpush.bf16.msrb.mxu0 %v519_v49 }
  0x33   :  { %434 = vmatpush.bf16.msrb.mxu1 %v583_v52 }
  0x34   :  { %392 = vmatpush.bf16.msrb.mxu2 %v515_v44  ;;  %406 = vmatpush.bf16.msrb.mxu3 %v579_v48 }
  0x92   :  { %v116_v54 = vpop.f32.mrf.mxu0 }
  0x93   :  { %v130_v55 = vpop.f32.mrf.mxu1  ;;  %v117_v58 = vadd.f32 %v116_v54, %v74_v56 }
  0x94   :  { %v131_v59 = vadd.f32 %v130_v55, %v75_v57 }
  0x95   :  { %v135_v0 = vmax.f32 %v117_v58, 0.0 }
  0x96   :  { %v136_v2 = vmax.f32 %v131_v59, 0.0 }
  0x9a   :  { %v118_v60 = vpop.f32.mrf.mxu0  ;;  %v206_v6 = vpop.f32.mrf.mxu2 }
  0x9b   :  { %v119_v61 = vadd.f32 %v118_v60, %v74_v56  ;;  %v132_v62 = vpop.f32.mrf.mxu1 }
  0x9c   :  { %v133_v63 = vadd.f32 %v132_v62, %v75_v57  ;;  %v220_v7 = vpop.f32.mrf.mxu3 }
  0x9d   :  { %v137_v1 = vmax.f32 %v119_v61, 0.0 }
  0x9e   :  { %v138_v3 = vmax.f32 %v133_v63, 0.0 }
  0x9f   :  { %v139_v4 = vpack.c.bf16 %v137_v1, %v135_v0 }
  0xa0   :  { %v140_v5 = vpack.c.bf16 %v138_v3, %v136_v2 }
  0xa1   :  { %393 = vmatmul.bf16.vlgmr.msrb.gmra.mxu2 %v139_v4  ;;  %421 = vmatmul.bf16.vlgmr.msrb.gmra.mxu0 %v139_v4 }
  0xa2   :  { %407 = vmatmul.bf16.vlgmr.msrb.gmra.mxu3 %v140_v5  ;;  %435 = vmatmul.bf16.vlgmr.msrb.gmra.mxu1 %v140_v5  ;;  %v208_v8 = vpop.f32.mrf.mxu2 }
  0xa4   :  { %v222_v9 = vpop.f32.mrf.mxu3 }
 0x11e   :  { %v422_v10 = vpop.f32.mrf.mxu0 }
 0x11f   :  { %v423_v12 = vadd.f32 %v422_v10, %v220_v7  ;;  %v436_v13 = vpop.f32.mrf.mxu1 }
 0x121   :  { %v437_v14 = vadd.f32 %v436_v13, %v423_v12 }
 0x123   :  { %v448_v17 = vadd.f32 %v444_v15, %v437_v14 }
 0x124   :  { %v394_v16 = vpop.f32.mrf.mxu2 }
 0x125   :  { %v395_v18 = vadd.f32 %v394_v16, %v206_v6  ;;  %v408_v19 = vpop.f32.mrf.mxu3  ;;  %v452_v27 = vmax.f32 %v448_v17, 0.0 }
 0x126   :  { %v424_v22 = vpop.f32.mrf.mxu0 }
 0x127   :  { %v409_v23 = vadd.f32 %v408_v19, %v395_v18  ;;  %v425_v24 = vadd.f32 %v424_v22, %v222_v9  ;;  %v438_v25 = vpop.f32.mrf.mxu1  ;;  %v462_v36 = vmul.f32 %v458_v26, %v452_v27 }
 0x129   :  { %v447_v28 = vadd.f32 %v443_v20, %v409_v23  ;;  %v439_v29 = vadd.f32 %v438_v25, %v425_v24 }
 0x12b   :  { %v451_v31 = vmax.f32 %v447_v28, 0.0  ;;  %v450_v33 = vadd.f32 %v444_v15, %v439_v29 }
 0x12c   :  { %v396_v32 = vpop.f32.mrf.mxu2 }
 0x12d   :  { %v397_v34 = vadd.f32 %v396_v32, %v208_v8  ;;  %v461_v35 = vmul.f32 %v457_v30, %v451_v31  ;;  %v410_v37 = vpop.f32.mrf.mxu3  ;;  %v454_v40 = vmax.f32 %v450_v33, 0.0 }
 0x12f   :  { %v411_v38 = vadd.f32 %v410_v37, %v397_v34  ;;  %v465_v39 = vadd.f32 %v462_v36, %v461_v35  ;;  %v464_v44 = vmul.f32 %v458_v26, %v454_v40 }
 0x131   :  { %v449_v41 = vadd.f32 %v443_v20, %v411_v38  ;;  %466 = vadd.xlane.f32.xlu0 %v465_v39 }
 0x133   :  { %v453_v42 = vmax.f32 %v449_v41, 0.0 }
 0x135   :  { %v463_v43 = vmul.f32 %v457_v30, %v453_v42 }
 0x137   :  { %v468_v45 = vadd.f32 %v464_v44, %v463_v43 }
 0x139   :  { %469 = vadd.xlane.f32.xlu0 %v468_v45 }
 0x1a4   :  { %v467_v47 = vpop.xlane.xlu0 %466 }
 0x1a5   :  { %v473_v48 = vadd.f32 %v472_v46, %v467_v47 }
 0x1a7   :  { %476 = vst.msk [vmem:[%s836_s9] sm:$0xff] %vm475_vm3, %v473_v48 }
 0x1ac   :  { %v470_v49 = vpop.xlane.xlu0 %469 }
 0x1ad   :  { %v474_v50 = vadd.f32 %v472_v46, %v470_v49 }
 0x1af   :  { %477 = vst.msk [vmem:[%s836_s9 + $0x8] sm:$0xff] %vm475_vm3, %v474_v50 }
 0x1b0   :  { %482 = vsyncpa [#allocation4], 1 }
 0x1b1   :  { %483 = vsyncpa [#allocation6], 1 }

</bundles_post_ra>
